<compile_context>
chip_gen: v7x
topology: tpu7x:2x2x1
jax: 0.10.0
libtpu: 0.0.40
codegen_flags: <defaults>
</compile_context>

<pallas_src>
import functools

import jax
import jax.numpy as jnp
from jax.experimental import pallas as pl
from jax.experimental.pallas import tpu as pltpu


def _round_up(x, m):
    return ((x + m - 1) // m) * m


def _pool_kernel(x_ref, sum_ref, max_ref, sum_acc, max_acc, *, hw, thw, ragged):
    """Streaming global sum/max pooling over the lane (spatial) axis.

    x_ref:   (TN, TC, THW) block of the (N, C, HW) input.
    sum_ref: (TN, TC) f32 spatial-sum output (written on the last hw step).
    max_ref: (TN, TC) f32 spatial-max output (written on the last hw step).
    sum_acc / max_acc: (TN, TC) f32 VMEM accumulators.
    """
    hb = pl.program_id(2)
    last = pl.num_programs(2) - 1

    @pl.when(hb == 0)
    def _init():
        sum_acc[...] = jnp.zeros_like(sum_acc)
        max_acc[...] = jnp.full_like(max_acc, -jnp.inf)

    x = x_ref[...]  # native dtype; no full-block f32 upcast

    if ragged:
        # HW is not a multiple of THW: the last spatial block's tail lanes
        # hold unspecified (out-of-bounds) data and must be masked.
        @pl.when(hb != last)
        def _acc_full():
            sum_acc[...] += jnp.sum(x, axis=-1, dtype=jnp.float32)
            max_acc[...] = jnp.maximum(
                max_acc[...], jnp.max(x, axis=-1).astype(jnp.float32))

        @pl.when(hb == last)
        def _acc_masked():
            lane = jax.lax.broadcasted_iota(jnp.int32, x.shape, x.ndim - 1)
            valid = (hb * thw + lane) < hw
            xs = jnp.where(valid, x, jnp.zeros((), dtype=x.dtype))
            xm = jnp.where(valid, x, jnp.full((), -jnp.inf, dtype=x.dtype))
            sum_acc[...] += jnp.sum(xs, axis=-1, dtype=jnp.float32)
            max_acc[...] = jnp.maximum(
                max_acc[...], jnp.max(xm, axis=-1).astype(jnp.float32))
    else:
        sum_acc[...] += jnp.sum(x, axis=-1, dtype=jnp.float32)
        max_acc[...] = jnp.maximum(
            max_acc[...], jnp.max(x, axis=-1).astype(jnp.float32))

    @pl.when(hb == last)
    def _finalize():
        sum_ref[...] = sum_acc[...]
        max_ref[...] = max_acc[...]


def _choose_tiles(n, c, hw, itemsize, target_bytes):
    """Pick (TN, TC, THW) for the pooling kernel."""
    # Batch tile: multiple of 8 (output sublane rule) unless N itself is small.
    tn = n if n <= 8 else 8
    # Channel tile: 128 when C allows (lane-dense output + second 'parallel'
    # grid axis for megacore on v7x); otherwise the full channel extent.
    tc = 128 if (c % 128 == 0 and c >= 128) else c
    # Spatial tile: largest multiple of 128 keeping the (double-buffered)
    # x block near the per-block byte target.
    row_bytes = max(1, tn * tc * itemsize)
    max_lanes = max(128, (target_bytes // row_bytes) // 128 * 128)
    hw128 = _round_up(hw, 128)
    thw = hw if hw128 <= max_lanes else max_lanes
    return tn, tc, thw


def channel_attention(x_nchw, w1_conv, w2_conv, *, target_bytes=8 << 20):
    """CBAM ChannelAttention forward.

    x_nchw:  (N, C, H, W) activations.
    w1_conv: (C//16, C, 1, 1) weight of the first bias-free 1x1 conv.
    w2_conv: (C, C//16, 1, 1) weight of the second bias-free 1x1 conv.
    Returns sigmoid attention weights of shape (N, C, 1, 1).
    """
    n, c, h, w = x_nchw.shape
    hw = h * w
    itemsize = jnp.dtype(x_nchw.dtype).itemsize

    # Free reshape: merge contiguous trailing dims (no transpose, no copy).
    x_flat = x_nchw.reshape(n, c, hw)

    tn, tc, thw = _choose_tiles(n, c, hw, itemsize, target_bytes)
    grid = (pl.cdiv(n, tn), c // tc, pl.cdiv(hw, thw))
    ragged = (hw % thw) != 0

    kernel = functools.partial(_pool_kernel, hw=hw, thw=thw, ragged=ragged)

    sum_pool, max_pool = pl.pallas_call(
        kernel,
        out_shape=(
            jax.ShapeDtypeStruct((n, c), jnp.float32),
            jax.ShapeDtypeStruct((n, c), jnp.float32),
        ),
        grid_spec=pltpu.PrefetchScalarGridSpec(
            num_scalar_prefetch=0,
            grid=grid,
            in_specs=[
                pl.BlockSpec((tn, tc, thw), lambda nb, cb, hb: (nb, cb, hb)),
            ],
            out_specs=[
                pl.BlockSpec((tn, tc), lambda nb, cb, hb: (nb, cb)),
                pl.BlockSpec((tn, tc), lambda nb, cb, hb: (nb, cb)),
            ],
            scratch_shapes=[
                pltpu.VMEM((tn, tc), jnp.float32),   # running spatial sum
                pltpu.VMEM((tn, tc), jnp.float32),   # running spatial max
            ],
        ),
        compiler_params=pltpu.CompilerParams(
            dimension_semantics=("parallel", "parallel", "arbitrary"),
            vmem_limit_bytes=40 << 20,
        ),
    )(x_flat)

    # Tiny shared MLP (two bias-free 1x1 convs) + sigmoid as an XLA epilogue:
    # a few thousand FLOPs on (N, C) vectors -- off the critical path of the
    # HBM-bound pooling (per the perf review).
    w1 = w1_conv[:, :, 0, 0].astype(jnp.float32)   # (Cr, C)
    w2 = w2_conv[:, :, 0, 0].astype(jnp.float32)   # (C, Cr)
    avg = sum_pool * jnp.float32(1.0 / hw)

    def fc(v):
        return jnp.maximum(v @ w1.T, 0.0) @ w2.T

    out = jax.nn.sigmoid(fc(avg) + fc(max_pool))
    return out.astype(x_nchw.dtype).reshape(n, c, 1, 1)


def _reference(x_nchw, w1_conv, w2_conv):
    """Pure-JAX reference of the PyTorch forward (for validation)."""
    n, c, h, w = x_nchw.shape
    xf = x_nchw.astype(jnp.float32)
    avg = jnp.mean(xf, axis=(2, 3))                 # (N, C)
    mx = jnp.max(xf, axis=(2, 3))                   # (N, C)
    w1 = w1_conv[:, :, 0, 0].astype(jnp.float32)    # (Cr, C)
    w2 = w2_conv[:, :, 0, 0].astype(jnp.float32)    # (C, Cr)

    def fc(v):
        return jnp.maximum(v @ w1.T, 0.0) @ w2.T

    out = jax.nn.sigmoid(fc(avg) + fc(mx))
    return out.astype(x_nchw.dtype).reshape(n, c, 1, 1)


if __name__ == "__main__":
    key = jax.random.PRNGKey(0)
    k_x1, k_w1, k_w2, k_x2 = jax.random.split(key, 4)

    # --- Case 1: friendly shapes (single spatial block, no masking) ---------
    N, C, H, W = 2, 64, 16, 16         # in_planes must be >= 16 so C//16 >= 1
    Cr = C // 16
    x = jax.random.normal(k_x1, (N, C, H, W), dtype=jnp.float32)
    w1_conv = jax.random.normal(k_w1, (Cr, C, 1, 1), dtype=jnp.float32) * 0.1
    w2_conv = jax.random.normal(k_w2, (C, Cr, 1, 1), dtype=jnp.float32) * 0.1

    out = jax.block_until_ready(channel_attention(x, w1_conv, w2_conv))
    ref = jax.block_until_ready(_reference(x, w1_conv, w2_conv))
    assert out.shape == (N, C, 1, 1)
    assert jnp.allclose(out, ref, atol=1e-5, rtol=1e-5), "case 1 mismatch"

    # --- Case 2: awkward shapes (ragged spatial tile + partial batch block) --
    N2, C2, H2, W2 = 10, 32, 12, 12    # HW = 144 (not a multiple of 128)
    Cr2 = max(1, C2 // 16)
    x2 = jax.random.normal(k_x2, (N2, C2, H2, W2), dtype=jnp.float32)
    w1b = jax.random.normal(k_w1, (Cr2, C2, 1, 1), dtype=jnp.float32) * 0.1
    w2b = jax.random.normal(k_w2, (C2, Cr2, 1, 1), dtype=jnp.float32) * 0.1

    # Small block-byte target forces THW=128 -> 2 spatial steps with a masked
    # ragged tail, plus a partial last batch block (N=10, TN=8).
    out2 = jax.block_until_ready(
        channel_attention(x2, w1b, w2b, target_bytes=32 * 1024))
    ref2 = jax.block_until_ready(_reference(x2, w1b, w2b))
    assert out2.shape == (N2, C2, 1, 1)
    assert jnp.allclose(out2, ref2, atol=1e-5, rtol=1e-5), "case 2 mismatch"

    print("KERNEL_OK")
</pallas_src>

<mosaic_0001>
module attributes {stable_mosaic.version = 11 : i64} {
  func.func @_pool_kernel(%arg0: i32, %arg1: i32, %arg2: i32, %arg3: memref<2x64x256xf32, #tpu.memory_space<vmem>>, %arg4: memref<2x64xf32, #tpu.memory_space<vmem>>, %arg5: memref<2x64xf32, #tpu.memory_space<vmem>>, %arg6: memref<2x64xf32, #tpu.memory_space<vmem>>, %arg7: memref<2x64xf32, #tpu.memory_space<vmem>>) attributes {dimension_semantics = [#tpu.dimension_semantics<parallel>, #tpu.dimension_semantics<parallel>, #tpu.dimension_semantics<arbitrary>], iteration_bounds = array<i64: 1, 1, 1>, scalar_prefetch = 0 : i64, scratch_operands = 2 : i64, tpu.core_type = #tpu.core_type<tc>, window_params = [{transform_indices = @transform_0, window_bounds = array<i64: 2, 64, 256>}, {transform_indices = @transform_1, window_bounds = array<i64: 2, 64>}, {transform_indices = @transform_2, window_bounds = array<i64: 2, 64>}]} {
    %c0_i32 = arith.constant 0 : i32
    %0 = arith.cmpi eq, %arg2, %c0_i32 : i32
    %1 = arith.extui %0 : i1 to i32
    %c0_i32_0 = arith.constant 0 : i32
    %2 = arith.cmpi ne, %1, %c0_i32_0 : i32
    scf.if %2 {
      %cst_14 = arith.constant 0.000000e+00 : f32
      %15 = vector.broadcast %cst_14 : f32 to vector<2x64xf32>
      %c0_15 = arith.constant 0 : index
      %c0_16 = arith.constant 0 : index
      %16 = vector.load %arg6[%c0_15, %c0_16] : memref<2x64xf32, #tpu.memory_space<vmem>>, vector<2x64xf32>
      tpu.vector_store %arg6[%c0_15, %c0_16], %15 {strides = array<i32>} : memref<2x64xf32, #tpu.memory_space<vmem>>, vector<2x64xf32>,
      %cst_17 = arith.constant 0xFF800000 : f32
      %17 = vector.broadcast %cst_17 : f32 to vector<2x64xf32>
      %c0_18 = arith.constant 0 : index
      %c0_19 = arith.constant 0 : index
      %18 = vector.load %arg7[%c0_18, %c0_19] : memref<2x64xf32, #tpu.memory_space<vmem>>, vector<2x64xf32>
      tpu.vector_store %arg7[%c0_18, %c0_19], %17 {strides = array<i32>} : memref<2x64xf32, #tpu.memory_space<vmem>>, vector<2x64xf32>,
    } else {
    }
    %c0 = arith.constant 0 : index
    %c0_1 = arith.constant 0 : index
    %c0_2 = arith.constant 0 : index
    %3 = vector.load %arg3[%c0, %c0_1, %c0_2] : memref<2x64x256xf32, #tpu.memory_space<vmem>>, vector<2x64x256xf32>
    %c0_3 = arith.constant 0 : index
    %c0_4 = arith.constant 0 : index
    %4 = vector.load %arg6[%c0_3, %c0_4] : memref<2x64xf32, #tpu.memory_space<vmem>>, vector<2x64xf32>
    %cst = arith.constant dense<0.000000e+00> : vector<2x64xf32>
    %5 = vector.multi_reduction <add>, %3, %cst [2] : vector<2x64x256xf32> to vector<2x64xf32>
    %6 = arith.addf %4, %5 : vector<2x64xf32>
    %c0_5 = arith.constant 0 : index
    %c0_6 = arith.constant 0 : index
    %7 = vector.load %arg6[%c0_5, %c0_6] : memref<2x64xf32, #tpu.memory_space<vmem>>, vector<2x64xf32>
    tpu.vector_store %arg6[%c0_5, %c0_6], %6 {strides = array<i32>} : memref<2x64xf32, #tpu.memory_space<vmem>>, vector<2x64xf32>,
    %c0_7 = arith.constant 0 : index
    %c0_8 = arith.constant 0 : index
    %8 = vector.load %arg7[%c0_7, %c0_8] : memref<2x64xf32, #tpu.memory_space<vmem>>, vector<2x64xf32>
    %cst_9 = arith.constant dense<0xFF800000> : vector<2x64xf32>
    %9 = vector.multi_reduction <maximumf>, %3, %cst_9 [2] : vector<2x64x256xf32> to vector<2x64xf32>
    %10 = arith.maximumf %8, %9 : vector<2x64xf32>
    %c0_10 = arith.constant 0 : index
    %c0_11 = arith.constant 0 : index
    %11 = vector.load %arg7[%c0_10, %c0_11] : memref<2x64xf32, #tpu.memory_space<vmem>>, vector<2x64xf32>
    tpu.vector_store %arg7[%c0_10, %c0_11], %10 {strides = array<i32>} : memref<2x64xf32, #tpu.memory_space<vmem>>, vector<2x64xf32>,
    %c0_i32_12 = arith.constant 0 : i32
    %12 = arith.cmpi eq, %arg2, %c0_i32_12 : i32
    %13 = arith.extui %12 : i1 to i32
    %c0_i32_13 = arith.constant 0 : i32
    %14 = arith.cmpi ne, %13, %c0_i32_13 : i32
    scf.if %14 {
      %c0_14 = arith.constant 0 : index
      %c0_15 = arith.constant 0 : index
      %15 = vector.load %arg6[%c0_14, %c0_15] : memref<2x64xf32, #tpu.memory_space<vmem>>, vector<2x64xf32>
      %c0_16 = arith.constant 0 : index
      %c0_17 = arith.constant 0 : index
      %16 = vector.load %arg4[%c0_16, %c0_17] : memref<2x64xf32, #tpu.memory_space<vmem>>, vector<2x64xf32>
      tpu.vector_store %arg4[%c0_16, %c0_17], %15 {strides = array<i32>} : memref<2x64xf32, #tpu.memory_space<vmem>>, vector<2x64xf32>,
      %c0_18 = arith.constant 0 : index
      %c0_19 = arith.constant 0 : index
      %17 = vector.load %arg7[%c0_18, %c0_19] : memref<2x64xf32, #tpu.memory_space<vmem>>, vector<2x64xf32>
      %c0_20 = arith.constant 0 : index
      %c0_21 = arith.constant 0 : index
      %18 = vector.load %arg5[%c0_20, %c0_21] : memref<2x64xf32, #tpu.memory_space<vmem>>, vector<2x64xf32>
      tpu.vector_store %arg5[%c0_20, %c0_21], %17 {strides = array<i32>} : memref<2x64xf32, #tpu.memory_space<vmem>>, vector<2x64xf32>,
    } else {
    }
    return
  }
  func.func @transform_0(%arg0: i32, %arg1: i32, %arg2: i32) -> (i32, i32, i32) {
    %c0_i32 = arith.constant 0 : i32
    return %arg0, %arg1, %arg2 : i32, i32, i32
  }
  func.func @transform_1(%arg0: i32, %arg1: i32, %arg2: i32) -> (i32, i32) {
    %c0_i32 = arith.constant 0 : i32
    return %arg0, %arg1 : i32, i32
  }
  func.func @transform_2(%arg0: i32, %arg1: i32, %arg2: i32) -> (i32, i32) {
    %c0_i32 = arith.constant 0 : i32
    return %arg0, %arg1 : i32, i32
  }
}

</mosaic_0001>

<bundles_post_ra>
// kernel: tpu_custom_call.1
= control target key start
LH: loop header
LB: loop body
LE: loop exit
PB: predicated region body
PF: predicated region fallthrough
CT: control target
= control target key end

     0   :  { %8 = vsyncpa [#allocation5], 0  ;;  %s688_s0 = inlined_call_operand.hbm [shape: f32[2,64,256], index: 0, kind: input, shape index: {}]   ;;  %s689_s1 = inlined_call_operand.hbm [shape: f32[2,64], index: 1, kind: output, shape index: {0}]   ;;  %s690_s2 = inlined_call_operand.hbm [shape: f32[2,64], index: 2, kind: output, shape index: {1}]  }
   0x1   :  { %9 = vsyncpa [#allocation6], 0 }
   0x2   :  { %10 = vsyncpa [#allocation9], 0  ;;  %s492_s9 = smov [#allocation4]   ;;  %s420_s13 = scalar_lea.hbm %s688_s0, 4096 }
   0x3   :  { %s16_s10 = sshll.u32 %s492_s9, 4  ;;  %p421_p0 = scmp.ne.s32.totalorder %s688_s0, %s420_s13  ;;  %s17_s10 = int_to_ptr.vmem [resolvable:$true] %s16_s10 }
   0x4   :  { %p424_p1 = scmp.lt.u32.totalorder %s420_s13, %s688_s0 }
   0x6   :  { %p426_p2 = pnand %p424_p1, %p421_p0 }
   0x8   :  { %429 = shalt.err (!%p426_p2)
}
   0x9   :  { %s430_s18 = scalar_lea.vmem %s17_s10, 4096  ;;  %p435_p4 = scmp.lt.s32.totalorder %s17_s10, %s17_s10 }
   0xa   :  { %p431_p3 = scmp.ne.s32.totalorder %s17_s10, %s430_s18  ;;  %p436_p5 = scmp.lt.s32.totalorder %s430_s18, %s430_s18 }
   0xc   :  { %p437_p6 = por %p436_p5, %p435_p4 }
   0xe   :  { %p438_p7 = pnand %p437_p6, %p431_p3 }
  0x10   :  { %441 = shalt.err (!%p438_p7)
}
  0x11   :  { %s493_s19 = smov 256   ;;  %s494_s20 = smov 16  }
  0x12   :  { %22 = dma.hbm_to_vmem [thread:$0]  %s688_s0, 4096, %s17_s10, [#allocation5], %s493_s19, %s493_s19, %s494_s20  }
  0x13   :  { %486 = dma.done.wait [#allocation5], 4096  }
  0x14   :  { %487 = vsyncadd [#allocation5], 4294963200  ;;  %v49_v0 = vld [vmem:[#allocation4 + $0x80] sm:$0xff]  ;;  %v50_v1 = vld [vmem:[#allocation4 + $0x88] sm:$0xff]  ;;  %vm30_vm0 = vcmask 517120   ;;  %vm141_vm1 = vcmask 130112  }
  0x15   :  { %v33_v2 = vld [vmem:[#allocation4] sm:$0xff]  ;;  %v90_v3 = vadd.f32 %v50_v1, %v49_v0  ;;  %v34_v4 = vld [vmem:[#allocation4 + $0x8] sm:$0xff]  ;;  %v51_v5 = vld [vmem:[#allocation4 + $0x90] sm:$0xff]  ;;  %v255_v15 = vmax.f32 %v49_v0, %v50_v1  ;;  %v495_v0 = vmov 0.0   ;;  %v496_v1 = vmov -inf   ;;  %s497_s0 = smov [#allocation7]  }
  0x16   :  { %v52_v6 = vld [vmem:[#allocation4 + $0x98] sm:$0xff]  ;;  %v66_v7 = vadd.f32 %v34_v4, %v33_v2  ;;  %v35_v8 = vld [vmem:[#allocation4 + $0x10] sm:$0xff]  ;;  %v231_v13 = vmax.f32 %v33_v2, %v34_v4  ;;  %v53_v16 = vld [vmem:[#allocation4 + $0xa0] sm:$0xff]  ;;  %31 = vst.msk [vmem:[#allocation2] sm:$0x3] %vm30_vm0, %v495_v0  ;;  %vm148_vm2 = vcmask 195712  }
  0x17   :  { %v36_v9 = vld [vmem:[#allocation4 + $0x18] sm:$0xff]  ;;  %91 = vadd.xlane.f32.xlu1 %v90_v3  ;;  %v93_v10 = vadd.f32 %v52_v6, %v51_v5  ;;  %v258_v14 = vmax.f32 %v51_v5, %v52_v6  ;;  %v54_v17 = vld [vmem:[#allocation4 + $0xa8] sm:$0xff]  ;;  %v37_v18 = vld [vmem:[#allocation4 + $0x20] sm:$0xff]  ;;  %32 = vst.msk [vmem:[#allocation3] sm:$0x3] %vm30_vm0, %v496_v1  ;;  %vm155_vm3 = vcmask 261312  }
  0x18   :  { %67 = vadd.xlane.f32.xlu0 %v66_v7  ;;  %v69_v11 = vadd.f32 %v36_v9, %v35_v8  ;;  %v234_v12 = vmax.f32 %v35_v8, %v36_v9  ;;  %v38_v19 = vld [vmem:[#allocation4 + $0x28] sm:$0xff]  ;;  %v96_v20 = vadd.f32 %v54_v17, %v53_v16  ;;  %v261_v22 = vmax.f32 %v53_v16, %v54_v17  ;;  %v55_v24 = vld [vmem:[#allocation4 + $0xb0] sm:$0xff]  ;;  %v56_v25 = vld [vmem:[#allocation4 + $0xb8] sm:$0xff]  ;;  %s390_s23 = sshll.u32 %s497_s0, 4  ;;  %s498_s24 = smov [#allocation8]   ;;  %s391_s23 = int_to_ptr.vmem [resolvable:$true] %s390_s23 }
  0x19   :  { %v72_v21 = vadd.f32 %v38_v19, %v37_v18  ;;  %v237_v23 = vmax.f32 %v37_v18, %v38_v19  ;;  %v39_v26 = vld [vmem:[#allocation4 + $0x30] sm:$0xff]  ;;  %v40_v27 = vld [vmem:[#allocation4 + $0x38] sm:$0xff]  ;;  %v99_v28 = vadd.f32 %v56_v25, %v55_v24  ;;  %v264_v30 = vmax.f32 %v55_v24, %v56_v25  ;;  %v57_v32 = vld [vmem:[#allocation4 + $0xc0] sm:$0xff]  ;;  %s400_s25 = sshll.u32 %s498_s24, 4  ;;  %s442_s26 = scalar_lea.vmem %s391_s23, 32  ;;  %s401_s25 = int_to_ptr.vmem [resolvable:$true] %s400_s25 }
  0x1a   :  { %v75_v29 = vadd.f32 %v40_v27, %v39_v26  ;;  %v240_v31 = vmax.f32 %v39_v26, %v40_v27  ;;  %v58_v33 = vld [vmem:[#allocation4 + $0xc8] sm:$0xff]  ;;  %v41_v34 = vld [vmem:[#allocation4 + $0x40] sm:$0xff]  ;;  %v59_v40 = vld [vmem:[#allocation4 + $0xd0] sm:$0xff]  ;;  %v130_v19 = vlaneseq  ;;  %vm162_vm4 = vcmask 326912   ;;  %p443_p8 = scmp.ne.s32.totalorder %s391_s23, %s442_s26  ;;  %p447_p9 = scmp.lt.s32.totalorder %s391_s23, %s391_s23 }
  0x1b   :  { %94 = vadd.xlane.f32.xlu1 %v93_v10  ;;  %v42_v35 = vld [vmem:[#allocation4 + $0x48] sm:$0xff]  ;;  %v102_v36 = vadd.f32 %v58_v33, %v57_v32  ;;  %v267_v38 = vmax.f32 %v57_v32, %v58_v33  ;;  %v60_v41 = vld [vmem:[#allocation4 + $0xd8] sm:$0xff]  ;;  %v43_v42 = vld [vmem:[#allocation4 + $0x50] sm:$0xff]  ;;  %vm169_vm5 = vcmask 392512   ;;  %vm176_vm6 = vcmask 458112   ;;  %p448_p10 = scmp.lt.s32.totalorder %s442_s26, %s442_s26 }
  0x1c   :  { %70 = vadd.xlane.f32.xlu0 %v69_v11  ;;  %v78_v37 = vadd.f32 %v42_v35, %v41_v34  ;;  %v243_v39 = vmax.f32 %v41_v34, %v42_v35  ;;  %v44_v43 = vld [vmem:[#allocation4 + $0x58] sm:$0xff]  ;;  %v105_v44 = vadd.f32 %v60_v41, %v59_v40  ;;  %v270_v46 = vmax.f32 %v59_v40, %v60_v41  ;;  %v61_v48 = vld [vmem:[#allocation4 + $0xe0] sm:$0xff]  ;;  %v62_v49 = vld [vmem:[#allocation4 + $0xe8] sm:$0xff] }
  0x1d   :  { %v81_v45 = vadd.f32 %v44_v43, %v43_v42  ;;  %v246_v47 = vmax.f32 %v43_v42, %v44_v43  ;;  %v45_v50 = vld [vmem:[#allocation4 + $0x60] sm:$0xff]  ;;  %v46_v51 = vld [vmem:[#allocation4 + $0x68] sm:$0xff]  ;;  %v108_v52 = vadd.f32 %v62_v49, %v61_v48  ;;  %v273_v54 = vmax.f32 %v61_v48, %v62_v49  ;;  %v63_v56 = vld [vmem:[#allocation4 + $0xf0] sm:$0xff]  ;;  %p449_p11 = por %p448_p10, %p447_p9 }
  0x1e   :  { %v84_v53 = vadd.f32 %v46_v51, %v45_v50  ;;  %v249_v55 = vmax.f32 %v45_v50, %v46_v51  ;;  %v64_v57 = vld [vmem:[#allocation4 + $0xf8] sm:$0xff]  ;;  %v47_v58 = vld [vmem:[#allocation4 + $0x70] sm:$0xff]  ;;  %v133_v25 = vshrl.u32 %v130_v19, 7  ;;  %vm183_vm7 = vcmask 523712  }
  0x1f   :  { %235 = vmax.xlane.f32.xlu1 %v234_v12  ;;  %v48_v59 = vld [vmem:[#allocation4 + $0x78] sm:$0xff]  ;;  %v111_v60 = vadd.f32 %v64_v57, %v63_v56  ;;  %v276_v62 = vmax.f32 %v63_v56, %v64_v57  ;;  %vm224_vm8 = vcmask 1041409   ;;  %p450_p12 = pnand %p449_p11, %p443_p8 }
  0x20   :  { %232 = vmax.xlane.f32.xlu0 %v231_v13  ;;  %v87_v61 = vadd.f32 %v48_v59, %v47_v58  ;;  %v252_v63 = vmax.f32 %v47_v58, %v48_v59 }
  0x23   :  { %259 = vmax.xlane.f32.xlu1 %v258_v14 }
  0x24   :  { %256 = vmax.xlane.f32.xlu0 %v255_v15 }
  0x27   :  { %97 = vadd.xlane.f32.xlu1 %v96_v20 }
  0x28   :  { %73 = vadd.xlane.f32.xlu0 %v72_v21 }
  0x2b   :  { %262 = vmax.xlane.f32.xlu1 %v261_v22  ;;  %v131_v22 = vand.u32 127, %v130_v19 }
  0x2c   :  { %238 = vmax.xlane.f32.xlu0 %v237_v23 }
  0x2d   :  { %v136_v24 = vadd.s32 4294967288, %v131_v22  ;;  %v143_v26 = vadd.s32 4294967280, %v131_v22  ;;  %v171_v32 = vadd.s32 4294967248, %v131_v22  ;;  %v178_v34 = vadd.s32 4294967240, %v131_v22 }
  0x2e   :  { %v134_v35 = vsub.s32 %v131_v22, %v133_v25 }
  0x2f   :  { %100 = vadd.xlane.f32.xlu1 %v99_v28  ;;  %v150_v28 = vadd.s32 4294967272, %v131_v22  ;;  %v139_v33 = vsub.s32 %v136_v24, %v133_v25  ;;  %v582_v42 = vsub.s32 %v171_v32, %v133_v25 }
  0x30   :  { %76 = vadd.xlane.f32.xlu0 %v75_v29  ;;  %v157_v29 = vadd.s32 4294967264, %v131_v22 }
  0x33   :  { %265 = vmax.xlane.f32.xlu1 %v264_v30 }
  0x34   :  { %241 = vmax.xlane.f32.xlu0 %v240_v31  ;;  %v164_v31 = vadd.s32 4294967256, %v131_v22 }
  0x36   :  { %v580_v41 = vsub.s32 %v164_v31, %v133_v25 }
  0x37   :  { %103 = vadd.xlane.f32.xlu1 %v102_v36  ;;  %v146_v36 = vsub.s32 %v143_v26, %v133_v25 }
  0x38   :  { %79 = vadd.xlane.f32.xlu0 %v78_v37 }
  0x3b   :  { %268 = vmax.xlane.f32.xlu1 %v267_v38  ;;  %v574_v38 = vsub.s32 %v150_v28, %v133_v25 }
  0x3c   :  { %244 = vmax.xlane.f32.xlu0 %v243_v39  ;;  %v576_v39 = vsub.s32 %v157_v29, %v133_v25 }
  0x3f   :  { %106 = vadd.xlane.f32.xlu1 %v105_v44 }
  0x40   :  { %82 = vadd.xlane.f32.xlu0 %v81_v45  ;;  %v586_v45 = vsub.s32 %v178_v34, %v133_v25  ;;  %v65_v34 = vld [vmem:[#allocation2] sm:$0x3] }
  0x43   :  { %271 = vmax.xlane.f32.xlu1 %v270_v46 }
  0x44   :  { %247 = vmax.xlane.f32.xlu0 %v246_v47 }
  0x47   :  { %109 = vadd.xlane.f32.xlu1 %v108_v52 }
  0x48   :  { %85 = vadd.xlane.f32.xlu0 %v84_v53 }
  0x4b   :  { %274 = vmax.xlane.f32.xlu1 %v273_v54 }
  0x4c   :  { %250 = vmax.xlane.f32.xlu0 %v249_v55 }
  0x4f   :  { %112 = vadd.xlane.f32.xlu1 %v111_v60 }
  0x50   :  { %88 = vadd.xlane.f32.xlu0 %v87_v61 }
  0x53   :  { %277 = vmax.xlane.f32.xlu1 %v276_v62 }
  0x54   :  { %253 = vmax.xlane.f32.xlu0 %v252_v63 }
  0xa4   :  { %v528_v2 = vpop.xlane.xlu1 %91 }
  0xa5   :  { %v530_v3 = vpop.xlane.xlu0 %67  ;;  %v188_v51 = vrot.slane %v528_v2, %v134_v35 }
  0xa6   :  { %v135_v52 = vrot.slane %v530_v3, %v134_v35 }
  0xa8   :  { %v532_v4 = vpop.xlane.xlu1 %94 }
  0xa9   :  { %v534_v5 = vpop.xlane.xlu0 %70  ;;  %v192_v43 = vrot.slane %v532_v4, %v139_v33 }
  0xaa   :  { %v140_v44 = vrot.slane %v534_v5, %v139_v33 }
  0xab   :  { %v193_v59 = vsel %vm141_vm1, %v192_v43, %v188_v51  ;;  %v230_v51 = vld [vmem:[#allocation3] sm:$0x3] }
  0xac   :  { %v536_v6 = vpop.xlane.xlu1 %235  ;;  %v142_v60 = vsel %vm141_vm1, %v140_v44, %v135_v52 }
  0xad   :  { %v538_v7 = vpop.xlane.xlu0 %232  ;;  %v302_v46 = vrot.slane %v536_v6, %v139_v33 }
  0xae   :  { %v298_v47 = vrot.slane %v538_v7, %v134_v35 }
  0xb0   :  { %v540_v8 = vpop.xlane.xlu1 %259  ;;  %v303_v62 = vsel %vm141_vm1, %v302_v46, %v298_v47 }
  0xb1   :  { %v542_v9 = vpop.xlane.xlu0 %256  ;;  %v341_v48 = vrot.slane %v540_v8, %v139_v33 }
  0xb2   :  { %v337_v49 = vrot.slane %v542_v9, %v134_v35 }
  0xb4   :  { %v544_v10 = vpop.xlane.xlu1 %97  ;;  %v342_v63 = vsel %vm141_vm1, %v341_v48, %v337_v49 }
  0xb5   :  { %v546_v11 = vpop.xlane.xlu0 %73  ;;  %v197_v53 = vrot.slane %v544_v10, %v146_v36 }
  0xb6   :  { %v147_v54 = vrot.slane %v546_v11, %v146_v36 }
  0xb7   :  { %v198_v3 = vsel %vm148_vm2, %v197_v53, %v193_v59 }
  0xb8   :  { %v548_v12 = vpop.xlane.xlu1 %262  ;;  %v149_v4 = vsel %vm148_vm2, %v147_v54, %v142_v60 }
  0xb9   :  { %v550_v13 = vpop.xlane.xlu0 %238  ;;  %v346_v56 = vrot.slane %v548_v12, %v146_v36 }
  0xba   :  { %v307_v57 = vrot.slane %v550_v13, %v146_v36 }
  0xbb   :  { %v347_v8 = vsel %vm148_vm2, %v346_v56, %v342_v63 }
  0xbc   :  { %v552_v14 = vpop.xlane.xlu1 %100  ;;  %v308_v9 = vsel %vm148_vm2, %v307_v57, %v303_v62 }
  0xbd   :  { %v554_v15 = vpop.xlane.xlu0 %76  ;;  %v202_v58 = vrot.slane %v552_v14, %v574_v38 }
  0xbe   :  { %v154_v61 = vrot.slane %v554_v15, %v574_v38 }
  0xbf   :  { %v203_v10 = vsel %vm155_vm3, %v202_v58, %v198_v3 }
  0xc0   :  { %v556_v16 = vpop.xlane.xlu1 %265  ;;  %v156_v12 = vsel %vm155_vm3, %v154_v61, %v149_v4 }
  0xc1   :  { %v558_v17 = vpop.xlane.xlu0 %241  ;;  %v351_v13 = vrot.slane %v556_v16, %v574_v38 }
  0xc2   :  { %v312_v14 = vrot.slane %v558_v17, %v574_v38 }
  0xc4   :  { %v560_v18 = vpop.xlane.xlu1 %103  ;;  %v313_v35 = vsel %vm155_vm3, %v312_v14, %v308_v9 }
  0xc5   :  { %v562_v20 = vpop.xlane.xlu0 %79  ;;  %v207_v0 = vrot.slane %v560_v18, %v576_v39 }
  0xc6   :  { %v161_v1 = vrot.slane %v562_v20, %v576_v39 }
  0xc7   :  { %v208_v18 = vsel %vm162_vm4, %v207_v0, %v203_v10 }
  0xc8   :  { %v564_v21 = vpop.xlane.xlu1 %268  ;;  %v163_v19 = vsel %vm162_vm4, %v161_v1, %v156_v12 }
  0xc9   :  { %v566_v23 = vpop.xlane.xlu0 %244  ;;  %v356_v20 = vrot.slane %v564_v21, %v576_v39 }
  0xca   :  { %v317_v22 = vrot.slane %v566_v23, %v576_v39 }
  0xcc   :  { %v568_v27 = vpop.xlane.xlu1 %106  ;;  %v318_v39 = vsel %vm162_vm4, %v317_v22, %v313_v35 }
  0xcd   :  { %v570_v30 = vpop.xlane.xlu0 %82  ;;  %v212_v5 = vrot.slane %v568_v27, %v580_v41 }
  0xce   :  { %v168_v6 = vrot.slane %v570_v30, %v580_v41  ;;  %v352_v30 = vsel %vm155_vm3, %v351_v13, %v347_v8 }
  0xcf   :  { %v213_v25 = vsel %vm169_vm5, %v212_v5, %v208_v18  ;;  %v357_v36 = vsel %vm162_vm4, %v356_v20, %v352_v30 }
  0xd0   :  { %v572_v37 = vpop.xlane.xlu1 %271  ;;  %v170_v16 = vsel %vm169_vm5, %v168_v6, %v163_v19 }
  0xd1   :  { %v578_v40 = vpop.xlane.xlu0 %247  ;;  %v361_v17 = vrot.slane %v572_v37, %v580_v41 }
  0xd2   :  { %v322_v28 = vrot.slane %v578_v40, %v580_v41 }
  0xd3   :  { %v362_v40 = vsel %vm169_vm5, %v361_v17, %v357_v36 }
  0xd4   :  { %v110_v50 = vpop.xlane.xlu1 %109 }
  0xd5   :  { %v86_v55 = vpop.xlane.xlu0 %85  ;;  %v217_v11 = vrot.slane %v110_v50, %v582_v42 }
  0xd6   :  { %v175_v15 = vrot.slane %v86_v55, %v582_v42 }
  0xd7   :  { %v218_v29 = vsel %vm176_vm6, %v217_v11, %v213_v25 }
  0xd8   :  { %v275_v2 = vpop.xlane.xlu1 %274  ;;  %v177_v31 = vsel %vm176_vm6, %v175_v15, %v170_v16 }
  0xd9   :  { %v251_v7 = vpop.xlane.xlu0 %250  ;;  %v366_v21 = vrot.slane %v275_v2, %v582_v42 }
  0xda   :  { %v327_v32 = vrot.slane %v251_v7, %v582_v42  ;;  %v323_v42 = vsel %vm169_vm5, %v322_v28, %v318_v39 }
  0xdb   :  { %v367_v46 = vsel %vm176_vm6, %v366_v21, %v362_v40 }
  0xdc   :  { %v113_v24 = vpop.xlane.xlu1 %112  ;;  %v328_v49 = vsel %vm176_vm6, %v327_v32, %v323_v42 }
  0xdd   :  { %v222_v26 = vrot.slane %v113_v24, %v586_v45  ;;  %v89_v27 = vpop.xlane.xlu0 %88 }
  0xde   :  { %v182_v23 = vrot.slane %v89_v27, %v586_v45 }
  0xdf   :  { %v223_v33 = vsel %vm183_vm7, %v222_v26, %v218_v29 }
  0xe0   :  { %v184_v37 = vsel %vm183_vm7, %v182_v23, %v177_v31  ;;  %v278_v38 = vpop.xlane.xlu1 %277 }
  0xe1   :  { %v225_v41 = vsel %vm224_vm8, %v223_v33, %v184_v37  ;;  %v371_v43 = vrot.slane %v278_v38, %v586_v45  ;;  %v254_v44 = vpop.xlane.xlu0 %253 }
  0xe2   :  { %v227_v47 = vadd.f32 %v225_v41, %v65_v34  ;;  %v332_v48 = vrot.slane %v254_v44, %v586_v45 }
  0xe3   :  { %v372_v50 = vsel %vm183_vm7, %v371_v43, %v367_v46 }
  0xe4   :  { %229 = vst.msk [vmem:[#allocation2] sm:$0x3] %vm30_vm0, %v227_v47  ;;  %v333_v52 = vsel %vm183_vm7, %v332_v48, %v328_v49 }
  0xe5   :  { %v373_v53 = vsel %vm224_vm8, %v372_v50, %v333_v52 }
  0xe6   :  { %v375_v54 = vmax.f32 %v230_v51, %v373_v53 }
  0xe8   :  { %376 = vst.msk [vmem:[#allocation3] sm:$0x3] %vm30_vm0, %v375_v54 }
  0xeb   :  { %v380_v55 = vld [vmem:[#allocation2] sm:$0x3] }
  0xec   :  { %381 = vst.msk [vmem:[#allocation7] sm:$0x3] %vm30_vm0, %v380_v55 }
  0xed   :  { %453 = shalt.err (!%p450_p12)
}
  0xee   :  { %s454_s29 = scalar_lea.hbm %s689_s1, 32 }
  0xef   :  { %p455_p13 = scmp.ne.s32.totalorder %s689_s1, %s454_s29  ;;  %p458_p0 = scmp.lt.u32.totalorder %s454_s29, %s689_s1 }
  0xf1   :  { %p460_p1 = pnand %p458_p0, %p455_p13 }
  0xf3   :  { %463 = shalt.err (!%p460_p1)
}
  0xf4   :  { %393 = dma.vmem_to_hbm [thread:$0]  %s391_s23, 32, %s689_s1, [#allocation6]   ;;  %v382_v45 = vld [vmem:[#allocation3] sm:$0x3] }
  0xf5   :  { %383 = vst.msk [vmem:[#allocation8] sm:$0x3] %vm30_vm0, %v382_v45  ;;  %s464_s8 = scalar_lea.vmem %s401_s25, 32  ;;  %p469_p3 = scmp.lt.s32.totalorder %s401_s25, %s401_s25 }
  0xf6   :  { %p465_p2 = scmp.ne.s32.totalorder %s401_s25, %s464_s8  ;;  %p470_p4 = scmp.lt.s32.totalorder %s464_s8, %s464_s8 }
  0xf8   :  { %p471_p5 = por %p470_p4, %p469_p3 }
  0xfa   :  { %p472_p6 = pnand %p471_p5, %p465_p2 }
  0xfc   :  { %475 = shalt.err (!%p472_p6)
}
  0xfd   :  { %s476_s11 = scalar_lea.hbm %s690_s2, 32 }
  0xfe   :  { %p477_p7 = scmp.ne.s32.totalorder %s690_s2, %s476_s11  ;;  %p480_p8 = scmp.lt.u32.totalorder %s476_s11, %s690_s2 }
 0x100   :  { %p482_p9 = pnand %p480_p8, %p477_p7 }
 0x102   :  { %485 = shalt.err (!%p482_p9)
}
 0x103   :  { %403 = dma.vmem_to_hbm [thread:$0]  %s401_s25, 32, %s690_s2, [#allocation9]  }
 0x104   :  { %488 = dma.done.wait [#allocation6], 32  }
 0x105   :  { %489 = vsyncadd [#allocation6], 4294967264 }
 0x106   :  { %490 = dma.done.wait [#allocation9], 32  }
 0x107   :  { %491 = vsyncadd [#allocation9], 4294967264 }
 0x108   :  { %410 = vsyncpa [#allocation5], 1 }
 0x109   :  { %411 = vsyncpa [#allocation6], 1 }
 0x10a   :  { %412 = vsyncpa [#allocation9], 1 }

</bundles_post_ra>
